<compile_context>
chip_gen: v6e
topology: v6e:2x2x1
jax: 0.10.0
libtpu: 0.0.40
codegen_flags: <defaults>
</compile_context>

<pallas_src>
import functools
import math

import jax
import jax.numpy as jnp
from jax.experimental import pallas as pl
from jax.experimental.pallas import tpu as pltpu


def vae_kernel(x_ref, eps_ref,
               w1_ref, b1_ref, w2_ref, b2_ref,
               wh_ref, bh_ref,
               wd1_ref, bd1_ref, wd2_ref, bd2_ref, wd3_ref, bd3_ref,
               out_ref, *, latent_dim):
    x = x_ref[...]

    # ---- encoder: Linear(D,64) + ReLU, Linear(64,32) + ReLU ----
    h = jnp.dot(x, w1_ref[...], preferred_element_type=jnp.float32) + b1_ref[...]
    h = jnp.maximum(h, 0.0)
    h = jnp.dot(h, w2_ref[...], preferred_element_type=jnp.float32) + b2_ref[...]
    h = jnp.maximum(h, 0.0)

    # ---- fused mu / log_var head: single (32, 2L) matmul, then slice ----
    head = jnp.dot(h, wh_ref[...], preferred_element_type=jnp.float32) + bh_ref[...]
    mu = head[:, :latent_dim]
    log_var = head[:, latent_dim:]

    # ---- reparameterize: z = mu + eps * exp(0.5 * log_var) ----
    z = mu + eps_ref[...] * jnp.exp(0.5 * log_var)
    # TODO(synk): could generate eps in-kernel via pltpu.prng_seed +
    # pltpu.stateful_normal (one fewer input stream); kept as an input for
    # deterministic parity with the pure-JAX reference.

    # ---- decoder: Linear(L,32)+ReLU, Linear(32,64)+ReLU, Linear(64,D)+Sigmoid ----
    d = jnp.dot(z, wd1_ref[...], preferred_element_type=jnp.float32) + bd1_ref[...]
    d = jnp.maximum(d, 0.0)
    d = jnp.dot(d, wd2_ref[...], preferred_element_type=jnp.float32) + bd2_ref[...]
    d = jnp.maximum(d, 0.0)
    logits = jnp.dot(d, wd3_ref[...], preferred_element_type=jnp.float32) + bd3_ref[...]
    recon = jax.nn.sigmoid(logits)

    # ---- lane-dense packed output: [x_recon | mu | log_var], single store ----
    out_ref[...] = jnp.concatenate([recon, mu, log_var], axis=-1)


def vae_forward(x, eps, params, *, tb=16):
    """x: (B, input_dim), eps: (B, latent_dim), params: dict of weights/biases.

    Returns (x_reconstructed, mu, log_var).
    """
    B, D = x.shape
    L = eps.shape[1]

    # Batch tile: second-to-last block dim must be a multiple of 8 or the full
    # batch.  Keep it simple: if the requested tile doesn't evenly divide B,
    # fall back to one whole-batch tile.
    if tb % 8 != 0 or B % tb != 0:
        tb = B
    grid = (pl.cdiv(B, tb),)

    weight_args = (
        params["w1"], params["b1"], params["w2"], params["b2"],
        params["whead"], params["bhead"],
        params["wd1"], params["bd1"], params["wd2"], params["bd2"],
        params["wd3"], params["bd3"],
    )

    def full_spec(arr):
        # Whole-array block, constant index_map: fetched once, VMEM-resident
        # across all grid steps.
        return pl.BlockSpec(arr.shape, lambda i: (0, 0))

    in_specs = (
        [pl.BlockSpec((tb, D), lambda i: (i, 0)),   # x
         pl.BlockSpec((tb, L), lambda i: (i, 0))]   # eps
        + [full_spec(w) for w in weight_args]
    )
    out_spec = pl.BlockSpec((tb, D + 2 * L), lambda i: (i, 0))
    out_shape = jax.ShapeDtypeStruct((B, D + 2 * L), jnp.float32)

    kernel = functools.partial(vae_kernel, latent_dim=L)

    packed = pl.pallas_call(
        kernel,
        grid=grid,
        in_specs=in_specs,
        out_specs=out_spec,
        out_shape=out_shape,
        compiler_params=pltpu.CompilerParams(
            dimension_semantics=("parallel",),
            vmem_limit_bytes=32 * 1024 * 1024,
        ),
    )(x, eps, *weight_args)

    x_recon = packed[:, :D]
    mu = packed[:, D:D + L]
    log_var = packed[:, D + L:]
    return x_recon, mu, log_var


def init_linear(key, fan_in, fan_out):
    """Matches nn.Linear default init: uniform(-1/sqrt(fan_in), 1/sqrt(fan_in)).
    Weight stored transposed: (fan_in, fan_out). Bias stored as (1, fan_out)."""
    kw, kb = jax.random.split(key)
    bound = 1.0 / math.sqrt(fan_in)
    w = jax.random.uniform(kw, (fan_in, fan_out), jnp.float32, -bound, bound)
    b = jax.random.uniform(kb, (1, fan_out), jnp.float32, -bound, bound)
    return w, b


def init_vae_params(key, input_dim, latent_dim):
    keys = jax.random.split(key, 7)
    params = {}
    params["w1"], params["b1"] = init_linear(keys[0], input_dim, 64)
    params["w2"], params["b2"] = init_linear(keys[1], 64, 32)
    wmu, bmu = init_linear(keys[2], 32, latent_dim)
    wlv, blv = init_linear(keys[3], 32, latent_dim)
    # Fused mu|log_var head: (32, 2L) weight, (1, 2L) bias.
    params["whead"] = jnp.concatenate([wmu, wlv], axis=1)
    params["bhead"] = jnp.concatenate([bmu, blv], axis=1)
    params["wd1"], params["bd1"] = init_linear(keys[4], latent_dim, 32)
    params["wd2"], params["bd2"] = init_linear(keys[5], 32, 64)
    params["wd3"], params["bd3"] = init_linear(keys[6], 64, input_dim)
    return params


if __name__ == "__main__":
    input_dim = 16
    latent_dim = 4
    batch = 64      # tiled into 4 batch blocks of 16 rows

    key = jax.random.PRNGKey(0)
    k_params, k_x, k_eps = jax.random.split(key, 3)

    params = init_vae_params(k_params, input_dim, latent_dim)
    x = jax.random.uniform(k_x, (batch, input_dim), jnp.float32)        # data in [0,1]
    eps = jax.random.normal(k_eps, (batch, latent_dim), jnp.float32)    # ~ randn_like(std)

    x_recon, mu, log_var = vae_forward(x, eps, params, tb=16)
    jax.block_until_ready((x_recon, mu, log_var))

    # Pure-JAX reference for sanity check.
    def ref_forward(x, eps, p, L):
        h = jnp.maximum(x @ p["w1"] + p["b1"], 0.0)
        h = jnp.maximum(h @ p["w2"] + p["b2"], 0.0)
        head = h @ p["whead"] + p["bhead"]
        mu = head[:, :L]
        lv = head[:, L:]
        z = mu + eps * jnp.exp(0.5 * lv)
        d = jnp.maximum(z @ p["wd1"] + p["bd1"], 0.0)
        d = jnp.maximum(d @ p["wd2"] + p["bd2"], 0.0)
        return jax.nn.sigmoid(d @ p["wd3"] + p["bd3"]), mu, lv

    xr_ref, mu_ref, lv_ref = ref_forward(x, eps, params, latent_dim)
    assert jnp.allclose(x_recon, xr_ref, atol=1e-5), "x_recon mismatch"
    assert jnp.allclose(mu, mu_ref, atol=1e-5), "mu mismatch"
    assert jnp.allclose(log_var, lv_ref, atol=1e-5), "log_var mismatch"

    assert x_recon.shape == (batch, input_dim)
    assert mu.shape == (batch, latent_dim)
    assert log_var.shape == (batch, latent_dim)

    print("KERNEL_OK")
</pallas_src>

<mosaic_0001>
module attributes {stable_mosaic.version = 11 : i64} {
  func.func @vae_kernel(%arg0: i32, %arg1: memref<16x16xf32, #tpu.memory_space<vmem>>, %arg2: memref<16x4xf32, #tpu.memory_space<vmem>>, %arg3: memref<16x64xf32, #tpu.memory_space<vmem>>, %arg4: memref<1x64xf32, #tpu.memory_space<vmem>>, %arg5: memref<64x32xf32, #tpu.memory_space<vmem>>, %arg6: memref<1x32xf32, #tpu.memory_space<vmem>>, %arg7: memref<32x8xf32, #tpu.memory_space<vmem>>, %arg8: memref<1x8xf32, #tpu.memory_space<vmem>>, %arg9: memref<4x32xf32, #tpu.memory_space<vmem>>, %arg10: memref<1x32xf32, #tpu.memory_space<vmem>>, %arg11: memref<32x64xf32, #tpu.memory_space<vmem>>, %arg12: memref<1x64xf32, #tpu.memory_space<vmem>>, %arg13: memref<64x16xf32, #tpu.memory_space<vmem>>, %arg14: memref<1x16xf32, #tpu.memory_space<vmem>>, %arg15: memref<16x24xf32, #tpu.memory_space<vmem>>) attributes {dimension_semantics = [#tpu.dimension_semantics<parallel>], iteration_bounds = array<i64: 4>, scalar_prefetch = 0 : i64, scratch_operands = 0 : i64, tpu.core_type = #tpu.core_type<tc>, window_params = [{transform_indices = @transform_0, window_bounds = array<i64: 16, 16>}, {transform_indices = @transform_1, window_bounds = array<i64: 16, 4>}, {pipeline_mode = #tpu.pipeline_mode<synchronous>, transform_indices = @transform_2, window_bounds = array<i64: 16, 64>}, {pipeline_mode = #tpu.pipeline_mode<synchronous>, transform_indices = @transform_3, window_bounds = array<i64: 1, 64>}, {pipeline_mode = #tpu.pipeline_mode<synchronous>, transform_indices = @transform_4, window_bounds = array<i64: 64, 32>}, {pipeline_mode = #tpu.pipeline_mode<synchronous>, transform_indices = @transform_5, window_bounds = array<i64: 1, 32>}, {pipeline_mode = #tpu.pipeline_mode<synchronous>, transform_indices = @transform_6, window_bounds = array<i64: 32, 8>}, {pipeline_mode = #tpu.pipeline_mode<synchronous>, transform_indices = @transform_7, window_bounds = array<i64: 1, 8>}, {pipeline_mode = #tpu.pipeline_mode<synchronous>, transform_indices = @transform_8, window_bounds = array<i64: 4, 32>}, {pipeline_mode = #tpu.pipeline_mode<synchronous>, transform_indices = @transform_9, window_bounds = array<i64: 1, 32>}, {pipeline_mode = #tpu.pipeline_mode<synchronous>, transform_indices = @transform_10, window_bounds = array<i64: 32, 64>}, {pipeline_mode = #tpu.pipeline_mode<synchronous>, transform_indices = @transform_11, window_bounds = array<i64: 1, 64>}, {pipeline_mode = #tpu.pipeline_mode<synchronous>, transform_indices = @transform_12, window_bounds = array<i64: 64, 16>}, {pipeline_mode = #tpu.pipeline_mode<synchronous>, transform_indices = @transform_13, window_bounds = array<i64: 1, 16>}, {transform_indices = @transform_14, window_bounds = array<i64: 16, 24>}]} {
    %c0 = arith.constant 0 : index
    %c0_0 = arith.constant 0 : index
    %0 = vector.load %arg1[%c0, %c0_0] : memref<16x16xf32, #tpu.memory_space<vmem>>, vector<16x16xf32>
    %c0_1 = arith.constant 0 : index
    %c0_2 = arith.constant 0 : index
    %1 = vector.load %arg3[%c0_1, %c0_2] : memref<16x64xf32, #tpu.memory_space<vmem>>, vector<16x64xf32>
    %cst = arith.constant dense<0.000000e+00> : vector<16x64xf32>
    %2 = tpu.matmul %0, %1, %cst {dimension_numbers = #tpu.dot_dimension_numbers<[1], [0], [0], [1], [0, 0, 1, 1], [], []>} : vector<16x16xf32>, vector<16x64xf32>, vector<16x64xf32> -> vector<16x64xf32>
    %c0_3 = arith.constant 0 : index
    %c0_4 = arith.constant 0 : index
    %3 = vector.load %arg4[%c0_3, %c0_4] : memref<1x64xf32, #tpu.memory_space<vmem>>, vector<1x64xf32>
    %4 = vector.broadcast %3 : vector<1x64xf32> to vector<16x64xf32>
    %5 = arith.addf %2, %4 : vector<16x64xf32>
    %cst_5 = arith.constant 0.000000e+00 : f32
    %6 = vector.broadcast %cst_5 : f32 to vector<16x64xf32>
    %7 = arith.maximumf %5, %6 : vector<16x64xf32>
    %c0_6 = arith.constant 0 : index
    %c0_7 = arith.constant 0 : index
    %8 = vector.load %arg5[%c0_6, %c0_7] : memref<64x32xf32, #tpu.memory_space<vmem>>, vector<64x32xf32>
    %cst_8 = arith.constant dense<0.000000e+00> : vector<16x32xf32>
    %9 = tpu.matmul %7, %8, %cst_8 {dimension_numbers = #tpu.dot_dimension_numbers<[1], [0], [0], [1], [0, 0, 1, 1], [], []>} : vector<16x64xf32>, vector<64x32xf32>, vector<16x32xf32> -> vector<16x32xf32>
    %c0_9 = arith.constant 0 : index
    %c0_10 = arith.constant 0 : index
    %10 = vector.load %arg6[%c0_9, %c0_10] : memref<1x32xf32, #tpu.memory_space<vmem>>, vector<1x32xf32>
    %11 = vector.broadcast %10 : vector<1x32xf32> to vector<16x32xf32>
    %12 = arith.addf %9, %11 : vector<16x32xf32>
    %cst_11 = arith.constant 0.000000e+00 : f32
    %13 = vector.broadcast %cst_11 : f32 to vector<16x32xf32>
    %14 = arith.maximumf %12, %13 : vector<16x32xf32>
    %c0_12 = arith.constant 0 : index
    %c0_13 = arith.constant 0 : index
    %15 = vector.load %arg7[%c0_12, %c0_13] : memref<32x8xf32, #tpu.memory_space<vmem>>, vector<32x8xf32>
    %cst_14 = arith.constant dense<0.000000e+00> : vector<16x8xf32>
    %16 = tpu.matmul %14, %15, %cst_14 {dimension_numbers = #tpu.dot_dimension_numbers<[1], [0], [0], [1], [0, 0, 1, 1], [], []>} : vector<16x32xf32>, vector<32x8xf32>, vector<16x8xf32> -> vector<16x8xf32>
    %c0_15 = arith.constant 0 : index
    %c0_16 = arith.constant 0 : index
    %17 = vector.load %arg8[%c0_15, %c0_16] : memref<1x8xf32, #tpu.memory_space<vmem>>, vector<1x8xf32>
    %18 = vector.broadcast %17 : vector<1x8xf32> to vector<16x8xf32>
    %19 = arith.addf %16, %18 : vector<16x8xf32>
    %20 = vector.extract_strided_slice %19 {offsets = [0, 0], sizes = [16, 4], strides = [1, 1]} : vector<16x8xf32> to vector<16x4xf32>
    %21 = vector.extract_strided_slice %19 {offsets = [0, 4], sizes = [16, 4], strides = [1, 1]} : vector<16x8xf32> to vector<16x4xf32>
    %c0_17 = arith.constant 0 : index
    %c0_18 = arith.constant 0 : index
    %22 = vector.load %arg2[%c0_17, %c0_18] : memref<16x4xf32, #tpu.memory_space<vmem>>, vector<16x4xf32>
    %cst_19 = arith.constant 5.000000e-01 : f32
    %23 = vector.broadcast %cst_19 : f32 to vector<16x4xf32>
    %24 = arith.mulf %23, %21 : vector<16x4xf32>
    %25 = math.exp %24 : vector<16x4xf32>
    %26 = arith.mulf %22, %25 : vector<16x4xf32>
    %27 = arith.addf %20, %26 : vector<16x4xf32>
    %c0_20 = arith.constant 0 : index
    %c0_21 = arith.constant 0 : index
    %28 = vector.load %arg9[%c0_20, %c0_21] : memref<4x32xf32, #tpu.memory_space<vmem>>, vector<4x32xf32>
    %cst_22 = arith.constant dense<0.000000e+00> : vector<16x32xf32>
    %29 = tpu.matmul %27, %28, %cst_22 {dimension_numbers = #tpu.dot_dimension_numbers<[1], [0], [0], [1], [0, 0, 1, 1], [], []>} : vector<16x4xf32>, vector<4x32xf32>, vector<16x32xf32> -> vector<16x32xf32>
    %c0_23 = arith.constant 0 : index
    %c0_24 = arith.constant 0 : index
    %30 = vector.load %arg10[%c0_23, %c0_24] : memref<1x32xf32, #tpu.memory_space<vmem>>, vector<1x32xf32>
    %31 = vector.broadcast %30 : vector<1x32xf32> to vector<16x32xf32>
    %32 = arith.addf %29, %31 : vector<16x32xf32>
    %cst_25 = arith.constant 0.000000e+00 : f32
    %33 = vector.broadcast %cst_25 : f32 to vector<16x32xf32>
    %34 = arith.maximumf %32, %33 : vector<16x32xf32>
    %c0_26 = arith.constant 0 : index
    %c0_27 = arith.constant 0 : index
    %35 = vector.load %arg11[%c0_26, %c0_27] : memref<32x64xf32, #tpu.memory_space<vmem>>, vector<32x64xf32>
    %cst_28 = arith.constant dense<0.000000e+00> : vector<16x64xf32>
    %36 = tpu.matmul %34, %35, %cst_28 {dimension_numbers = #tpu.dot_dimension_numbers<[1], [0], [0], [1], [0, 0, 1, 1], [], []>} : vector<16x32xf32>, vector<32x64xf32>, vector<16x64xf32> -> vector<16x64xf32>
    %c0_29 = arith.constant 0 : index
    %c0_30 = arith.constant 0 : index
    %37 = vector.load %arg12[%c0_29, %c0_30] : memref<1x64xf32, #tpu.memory_space<vmem>>, vector<1x64xf32>
    %38 = vector.broadcast %37 : vector<1x64xf32> to vector<16x64xf32>
    %39 = arith.addf %36, %38 : vector<16x64xf32>
    %cst_31 = arith.constant 0.000000e+00 : f32
    %40 = vector.broadcast %cst_31 : f32 to vector<16x64xf32>
    %41 = arith.maximumf %39, %40 : vector<16x64xf32>
    %c0_32 = arith.constant 0 : index
    %c0_33 = arith.constant 0 : index
    %42 = vector.load %arg13[%c0_32, %c0_33] : memref<64x16xf32, #tpu.memory_space<vmem>>, vector<64x16xf32>
    %cst_34 = arith.constant dense<0.000000e+00> : vector<16x16xf32>
    %43 = tpu.matmul %41, %42, %cst_34 {dimension_numbers = #tpu.dot_dimension_numbers<[1], [0], [0], [1], [0, 0, 1, 1], [], []>} : vector<16x64xf32>, vector<64x16xf32>, vector<16x16xf32> -> vector<16x16xf32>
    %c0_35 = arith.constant 0 : index
    %c0_36 = arith.constant 0 : index
    %44 = vector.load %arg14[%c0_35, %c0_36] : memref<1x16xf32, #tpu.memory_space<vmem>>, vector<1x16xf32>
    %45 = vector.broadcast %44 : vector<1x16xf32> to vector<16x16xf32>
    %46 = arith.addf %43, %45 : vector<16x16xf32>
    %47 = arith.negf %46 : vector<16x16xf32>
    %48 = math.exp %47 : vector<16x16xf32>
    %cst_37 = arith.constant 1.000000e+00 : f32
    %49 = vector.broadcast %cst_37 : f32 to vector<16x16xf32>
    %50 = arith.addf %49, %48 : vector<16x16xf32>
    %51 = arith.divf %49, %50 : vector<16x16xf32>
    %52 = tpu.concatenate %51, %20, %21 in 1 : vector<16x16xf32>, vector<16x4xf32>, vector<16x4xf32> -> vector<16x24xf32>
    %c0_38 = arith.constant 0 : index
    %c0_39 = arith.constant 0 : index
    %53 = vector.load %arg15[%c0_38, %c0_39] : memref<16x24xf32, #tpu.memory_space<vmem>>, vector<16x24xf32>
    tpu.vector_store %arg15[%c0_38, %c0_39], %52 {strides = array<i32>} : memref<16x24xf32, #tpu.memory_space<vmem>>, vector<16x24xf32>,
    return
  }
  func.func @transform_0(%arg0: i32) -> (i32, i32) {
    %c0_i32 = arith.constant 0 : i32
    %c0_i32_0 = arith.constant 0 : i32
    return %arg0, %c0_i32 : i32, i32
  }
  func.func @transform_1(%arg0: i32) -> (i32, i32) {
    %c0_i32 = arith.constant 0 : i32
    %c0_i32_0 = arith.constant 0 : i32
    return %arg0, %c0_i32 : i32, i32
  }
  func.func @transform_2(%arg0: i32) -> (i32, i32) {
    %c0_i32 = arith.constant 0 : i32
    %c0_i32_0 = arith.constant 0 : i32
    %c0_i32_1 = arith.constant 0 : i32
    return %c0_i32, %c0_i32_0 : i32, i32
  }
  func.func @transform_3(%arg0: i32) -> (i32, i32) {
    %c0_i32 = arith.constant 0 : i32
    %c0_i32_0 = arith.constant 0 : i32
    %c0_i32_1 = arith.constant 0 : i32
    return %c0_i32, %c0_i32_0 : i32, i32
  }
  func.func @transform_4(%arg0: i32) -> (i32, i32) {
    %c0_i32 = arith.constant 0 : i32
    %c0_i32_0 = arith.constant 0 : i32
    %c0_i32_1 = arith.constant 0 : i32
    return %c0_i32, %c0_i32_0 : i32, i32
  }
  func.func @transform_5(%arg0: i32) -> (i32, i32) {
    %c0_i32 = arith.constant 0 : i32
    %c0_i32_0 = arith.constant 0 : i32
    %c0_i32_1 = arith.constant 0 : i32
    return %c0_i32, %c0_i32_0 : i32, i32
  }
  func.func @transform_6(%arg0: i32) -> (i32, i32) {
    %c0_i32 = arith.constant 0 : i32
    %c0_i32_0 = arith.constant 0 : i32
    %c0_i32_1 = arith.constant 0 : i32
    return %c0_i32, %c0_i32_0 : i32, i32
  }
  func.func @transform_7(%arg0: i32) -> (i32, i32) {
    %c0_i32 = arith.constant 0 : i32
    %c0_i32_0 = arith.constant 0 : i32
    %c0_i32_1 = arith.constant 0 : i32
    return %c0_i32, %c0_i32_0 : i32, i32
  }
  func.func @transform_8(%arg0: i32) -> (i32, i32) {
    %c0_i32 = arith.constant 0 : i32
    %c0_i32_0 = arith.constant 0 : i32
    %c0_i32_1 = arith.constant 0 : i32
    return %c0_i32, %c0_i32_0 : i32, i32
  }
  func.func @transform_9(%arg0: i32) -> (i32, i32) {
    %c0_i32 = arith.constant 0 : i32
    %c0_i32_0 = arith.constant 0 : i32
    %c0_i32_1 = arith.constant 0 : i32
    return %c0_i32, %c0_i32_0 : i32, i32
  }
  func.func @transform_10(%arg0: i32) -> (i32, i32) {
    %c0_i32 = arith.constant 0 : i32
    %c0_i32_0 = arith.constant 0 : i32
    %c0_i32_1 = arith.constant 0 : i32
    return %c0_i32, %c0_i32_0 : i32, i32
  }
  func.func @transform_11(%arg0: i32) -> (i32, i32) {
    %c0_i32 = arith.constant 0 : i32
    %c0_i32_0 = arith.constant 0 : i32
    %c0_i32_1 = arith.constant 0 : i32
    return %c0_i32, %c0_i32_0 : i32, i32
  }
  func.func @transform_12(%arg0: i32) -> (i32, i32) {
    %c0_i32 = arith.constant 0 : i32
    %c0_i32_0 = arith.constant 0 : i32
    %c0_i32_1 = arith.constant 0 : i32
    return %c0_i32, %c0_i32_0 : i32, i32
  }
  func.func @transform_13(%arg0: i32) -> (i32, i32) {
    %c0_i32 = arith.constant 0 : i32
    %c0_i32_0 = arith.constant 0 : i32
    %c0_i32_1 = arith.constant 0 : i32
    return %c0_i32, %c0_i32_0 : i32, i32
  }
  func.func @transform_14(%arg0: i32) -> (i32, i32) {
    %c0_i32 = arith.constant 0 : i32
    %c0_i32_0 = arith.constant 0 : i32
    return %arg0, %c0_i32 : i32, i32
  }
}

</mosaic_0001>

<bundles_post_ra>
// kernel: tpu_custom_call.1
= control target key start
LH: loop header
LB: loop body
LE: loop exit
PB: predicated region body
PF: predicated region fallthrough
CT: control target
= control target key end

     0   :  { %s1434_s29 = smov 0   ;;  %s1570_s0 = inlined_call_operand.vmem [shape: f32[64,16], index: 0, kind: input, shape index: {}]   ;;  %s1571_s1 = inlined_call_operand.vmem [shape: f32[64,4], index: 1, kind: input, shape index: {}]   ;;  %s1572_s2 = inlined_call_operand.vmem [shape: f32[16,64], index: 2, kind: input, shape index: {}]   ;;  %s1573_s3 = inlined_call_operand.vmem [shape: f32[1,64], index: 3, kind: input, shape index: {}]   ;;  %s1574_s4 = inlined_call_operand.vmem [shape: f32[64,32], index: 4, kind: input, shape index: {}]   ;;  %s1575_s5 = inlined_call_operand.vmem [shape: f32[1,32], index: 5, kind: input, shape index: {}]   ;;  %s1576_s6 = inlined_call_operand.vmem [shape: f32[32,8], index: 6, kind: input, shape index: {}]   ;;  %s1577_s7 = inlined_call_operand.vmem [shape: f32[1,8], index: 7, kind: input, shape index: {}]   ;;  %s1578_s8 = inlined_call_operand.vmem [shape: f32[4,32], index: 8, kind: input, shape index: {}]   ;;  %s1579_s9 = inlined_call_operand.vmem [shape: f32[1,32], index: 9, kind: input, shape index: {}]   ;;  %s1580_s10 = inlined_call_operand.vmem [shape: f32[32,64], index: 10, kind: input, shape index: {}]   ;;  %s1581_s11 = inlined_call_operand.vmem [shape: f32[1,64], index: 11, kind: input, shape index: {}]   ;;  %s1582_s12 = inlined_call_operand.vmem [shape: f32[64,16], index: 12, kind: input, shape index: {}]   ;;  %s1583_s13 = inlined_call_operand.vmem [shape: f32[1,16], index: 13, kind: input, shape index: {}]   ;;  %s1584_s14 = inlined_call_operand.vmem [shape: f32[64,24], index: 14, kind: output, shape index: {}]  }
   0x1 LB: > { %s1182_s30 = sadd.s32 4294967295, %s1355_s29   ;;  %p1186_p0 = scmp.ge.s32.totalorder %s1355_s29, 1  ;;  %s1355_s29 = sphi %s1434_s29, %s24_s29  }
   0x2   : > { %p424_p1 = scmp.lt.s32.totalorder %s1355_s29, 5 }
   0x4   : > { %p425_p2 = pnand %p1186_p0, %p424_p1 }
   0x5   : > { %s1187_s19 = sshll.u32 (!%p425_p2), %s1182_s30, 1  ;;  %s1357_s25 = smov (!%p425_p2), 16  }
   0x6   : > { %428 = sbr.rel (%p425_p2) target bundleno = 1387 (0x56b), region = 76  ;;  %p476_p3 = scmp.lt.s32.totalorder (!%p425_p2), %s1187_s19, 7 }
   0x7   : > { %s1358_s30 = smov (!%p425_p2), 124  }
   0xb   : > { %v496_v0 = vld [vmem:[%s1572_s2 + $0x8] sm:$0xff]  ;;  %v495_v1 = vld [vmem:[%s1572_s2] sm:$0xff]  ;;  %v595_v2 = vld [vmem:[%s1574_s4 + $0x38] sm:$0xff]  ;;  %s1586_s19 = smov (!%p476_p3, %s1187_s19), 7  ;;  %vm504_vm0 = vcmask 130048   ;;  %vm603_vm1 = vcmask 523264  }
   0xc   : > { %1255 = vmatprep.subr.mxu0 %v496_v0  ;;  %1262 = vmatprep.subr.mxu1 %v595_v2  ;;  %v594_v3 = vld [vmem:[%s1574_s4 + $0x30] sm:$0xff]  ;;  %v593_v4 = vld [vmem:[%s1574_s4 + $0x28] sm:$0xff]  ;;  %v592_v5 = vld [vmem:[%s1574_s4 + $0x20] sm:$0xff]  ;;  %s1460_s28 = sshll.u32 %s1586_s19, 3  ;;  %vm698_vm2 = vcmask 261120   ;;  %vm815_vm3 = vcmask 1043456  }
   0xd   : > { %1256 = vmatpush3.msra.mxu0 %v496_v0  ;;  %1263 = vmatpush3.msra.mxu1 %v595_v2  ;;  %s479_s16 = scalar_lea.vmem %s1570_s0, %s1460_s28  ;;  %v591_v8 = vld [vmem:[%s1574_s4 + $0x18] sm:$0xff]  ;;  %v590_v9 = vld [vmem:[%s1574_s4 + $0x10] sm:$0xff]  ;;  %v589_v10 = vld [vmem:[%s1574_s4 + $0x8] sm:$0xff]  ;;  %s485_s17 = scalar_lea.vmem %s1571_s1, %s1460_s28  ;;  %vm808_vm4 = vcmask 31744   ;;  %vm1108_vm5 = vcmask 162816   ;;  %vm1111_vm6 = vcmask 195584  }
   0xe   : > { %1257 = vmatprep.subr.mxu0 %v495_v1  ;;  %1264 = vmatprep.subr.mxu1 %v594_v3  ;;  %v493_v6 = vld [vmem:[%s479_s16] sm:$0xff]  ;;  %v494_v7 = vld [vmem:[%s479_s16 + $0x8] sm:$0xff]  ;;  %v690_v19 = vld [vmem:[%s1576_s6 + $0x18] sm:$0xff]  ;;  %s491_s22 = scalar_lea.vmem %s1584_s14, %s1460_s28 }
   0xf   : > { %1258 = vmatpush3.msra.mxu0 %v495_v1  ;;  %1265 = vmatpush3.msra.mxu1 %v594_v3  ;;  %v588_v11 = vld [vmem:[%s1574_s4] sm:$0xff]  ;;  %v689_v20 = vld [vmem:[%s1576_s6 + $0x10] sm:$0xff]  ;;  %v688_v21 = vld [vmem:[%s1576_s6 + $0x8] sm:$0xff] }
  0x10   : > { %1266 = vmatprep.subr.mxu1 %v593_v4  ;;  %1259 = vmatprep.mubr.msk.f32.mxu0 %vm504_vm0, %v493_v6  ;;  %v1193_v12 = vld [vmem:[%s1573_s3] ss:$0 sm:$0xff]  ;;  %v781_v45 = vld [vmem:[%s485_s17 + $0x8] sm:$0xff]  ;;  %v899_v50 = vld [vmem:[%s1580_s10 + $0x18] sm:$0xff] }
  0x11   : > { %1267 = vmatpush3.msra.mxu1 %v593_v4  ;;  %1260 = vmatmul.mubr.msk.f32.vlgmr.msra.gmra.mxu0 %vm504_vm0, %v494_v7  ;;  %v687_v22 = vld [vmem:[%s1576_s6] sm:$0xff]  ;;  %v898_v51 = vld [vmem:[%s1580_s10 + $0x10] sm:$0xff]  ;;  %v897_v52 = vld [vmem:[%s1580_s10 + $0x8] sm:$0xff] }
  0x12   : > { %1268 = vmatprep.subr.mxu1 %v592_v5  ;;  %1281 = vmatprep.subr.mxu0 %v690_v19  ;;  %v1196_v23 = vld [vmem:[%s1575_s5] ss:$0 sm:$0xff]  ;;  %v997_v54 = vld [vmem:[%s1582_s12 + $0x38] sm:$0xff]  ;;  %v996_v55 = vld [vmem:[%s1582_s12 + $0x30] sm:$0xff] }
  0x13   : > { %1269 = vmatpush3.msra.mxu1 %v592_v5  ;;  %1282 = vmatpush3.msra.mxu0 %v690_v19  ;;  %v1199_v30 = vld [vmem:[%s1577_s7] ss:$0 sm:$0xff]  ;;  %v995_v56 = vld [vmem:[%s1582_s12 + $0x28] sm:$0xff]  ;;  %v993_v1 = vld [vmem:[%s1582_s12 + $0x18] sm:$0xff] }
  0x14   : > { %1270 = vmatprep.subr.mxu1 %v591_v8  ;;  %1283 = vmatprep.subr.mxu0 %v689_v20  ;;  %v800_v39 = vld [vmem:[%s1578_s8] sm:$0xf]  ;;  %v992_v2 = vld [vmem:[%s1582_s12 + $0x10] sm:$0xff]  ;;  %v991_v3 = vld [vmem:[%s1582_s12 + $0x8] sm:$0xff] }
  0x15   : > { %1271 = vmatpush3.msra.mxu1 %v591_v8  ;;  %1284 = vmatpush3.msra.mxu0 %v689_v20  ;;  %v780_v42 = vld [vmem:[%s485_s17] sm:$0xff] }
  0x16   : > { %1272 = vmatprep.subr.mxu1 %v590_v9  ;;  %1285 = vmatprep.subr.mxu0 %v688_v21  ;;  %v896_v53 = vld [vmem:[%s1580_s10] sm:$0xff] }
  0x17   : > { %1273 = vmatpush3.msra.mxu1 %v590_v9  ;;  %1286 = vmatpush3.msra.mxu0 %v688_v21  ;;  %v994_v57 = vld [vmem:[%s1582_s12 + $0x20] sm:$0xff] }
  0x18   : > { %1274 = vmatprep.subr.mxu1 %v589_v10  ;;  %1287 = vmatprep.subr.mxu0 %v687_v22  ;;  %v1202_v58 = vld [vmem:[%s1579_s9] ss:$0 sm:$0xff] }
  0x19   : > { %1275 = vmatpush3.msra.mxu1 %v589_v10  ;;  %1288 = vmatpush3.msra.mxu0 %v687_v22  ;;  %v990_v4 = vld [vmem:[%s1582_s12] sm:$0xff] }
  0x1a   : > { %1276 = vmatprep.subr.mxu1 %v588_v11  ;;  %1292 = vmatprep.subr.msk.mxu0 %vm815_vm3, %v800_v39  ;;  %v1206_v5 = vld [vmem:[%s1581_s11] ss:$0 sm:$0xff] }
  0x1b   : > { %1277 = vmatpush3.msra.mxu1 %v588_v11 }
  0x1c   : > { %1308 = vmatprep.subr.mxu1 %v997_v54 }
  0xd1   : > { %v1261_v13 = vpop.f32.mrf.mxu0 }
  0xd2   : > { %v583_v14 = vadd.f32 %v1261_v13, %v1193_v12 }
  0xd3   : > { %v577_v15 = vpop.f32.mrf.mxu0 }
  0xd4   : > { %v578_v16 = vadd.f32 %v1193_v12, %v577_v15  ;;  %v587_v18 = vmax.f32 %v583_v14, 0.0  ;;  %v1209_v12 = vld [vmem:[%s1583_s13] ss:$0 sm:$0xff] }
  0xd6   : > { %v586_v17 = vmax.f32 %v578_v16, 0.0 }
  0xd8   : > { %1278 = vmatprep.mubr.msk.f32.mxu1 %vm603_vm1, %v586_v17 }
  0xd9   : > { %1279 = vmatmul.mubr.msk.f32.vlgmr.msra.gmra.mxu1 %vm603_vm1, %v587_v18 }
  0xda   : > { %1309 = vmatpush3.msra.mxu1 %v997_v54 }
  0xdb   : > { %1310 = vmatprep.subr.mxu1 %v996_v55 }
  0xdc   : > { %1311 = vmatpush3.msra.mxu1 %v996_v55 }
  0xdd   : > { %1312 = vmatprep.subr.mxu1 %v995_v56 }
  0xde   : > { %1313 = vmatpush3.msra.mxu1 %v995_v56 }
  0xdf   : > { %1314 = vmatprep.subr.mxu1 %v994_v57 }
  0xe0   : > { %1315 = vmatpush3.msra.mxu1 %v994_v57 }
  0xe1   : > { %1316 = vmatprep.subr.mxu1 %v993_v1 }
  0xe2   : > { %1317 = vmatpush3.msra.mxu1 %v993_v1 }
  0xe3   : > { %1318 = vmatprep.subr.mxu1 %v992_v2 }
  0xe4   : > { %1319 = vmatpush3.msra.mxu1 %v992_v2 }
  0xe5   : > { %1320 = vmatprep.subr.mxu1 %v991_v3 }
  0xe6   : > { %1321 = vmatpush3.msra.mxu1 %v991_v3 }
  0xe7   : > { %1322 = vmatprep.subr.mxu1 %v990_v4 }
  0xe8   : > { %1323 = vmatpush3.msra.mxu1 %v990_v4 }
 0x199   : > { %v1280_v24 = vpop.f32.mrf.mxu1 }
 0x19a   : > { %v682_v25 = vadd.f32 %v1280_v24, %v1196_v23 }
 0x19b   : > { %v676_v26 = vpop.f32.mrf.mxu1 }
 0x19c   : > { %v677_v27 = vadd.f32 %v1196_v23, %v676_v26  ;;  %v686_v29 = vmax.f32 %v682_v25, 0.0 }
 0x19e   : > { %v685_v28 = vmax.f32 %v677_v27, 0.0 }
 0x1a0   : > { %1289 = vmatprep.mubr.msk.f32.mxu0 %vm698_vm2, %v685_v28 }
 0x1a1   : > { %1290 = vmatmul.mubr.msk.f32.vlgmr.msra.gmra.mxu0 %vm698_vm2, %v686_v29 }
 0x1a2   : > { %1293 = vmatpush3.msk.msra.mxu0 %vm815_vm3, %v800_v39 }
 0x1a3   : > { %1297 = vmatprep.subr.mxu0 %v899_v50 }
 0x261   : > { %v1291_v31 = vpop.f32.mrf.mxu0 }
 0x262   : > { %v777_v32 = vadd.f32 %v1291_v31, %v1199_v30 }
 0x263   : > { %v771_v33 = vpop.f32.mrf.mxu0 }
 0x264   : > { %v772_v34 = vadd.f32 %v1199_v30, %v771_v33  ;;  %v783_v35 = vmul.f32 0.5, %v777_v32 }
 0x266   : > { %v782_v36 = vmul.f32 0.5, %v772_v34  ;;  %1100 = vrot.lane.b32.xlu1 %v772_v34, %s1357_s25  ;;  %v786_v38 = vmul.f32 1.442695, %v783_v35 }
 0x268   : > { %v784_v37 = vmul.f32 1.442695, %v782_v36 }
 0x26a   : > { %1337 = vpow2.f32 %v784_v37  ;;  %1102 = vrot.lane.b32.xlu1 %v777_v32, %s1357_s25 }
 0x26b   : > { %1339 = vpow2.f32 %v786_v38 }
 0x277   : > { %v1338_v40 = vpop.eup %1337 }
 0x278   : > { %790 = vrot.lane.b32.xlu0 %v1338_v40, %s1358_s30  ;;  %v1340_v41 = vpop.eup %1339 }
 0x27c   : > { %792 = vrot.lane.b32.xlu0 %v1340_v41, %s1358_s30 }
 0x2d8   : > { %v1101_v23 = vpop.permute.xlu1 %1100 }
 0x2dc   : > { %v1103_v25 = vpop.permute.xlu1 %1102 }
 0x2ea   : > { %v791_v43 = vpop.permute.xlu0 %790 }
 0x2eb   : > { %v796_v44 = vmul.f32 %v791_v43, %v780_v42 }
 0x2ed   : > { %v798_v46 = vadd.f32 %v796_v44, %v772_v34 }
 0x2ee   : > { %v793_v47 = vpop.permute.xlu0 %792 }
 0x2ef   : > { %v797_v48 = vmul.f32 %v793_v47, %v781_v45  ;;  %1294 = vmatprep.mubr.msk.f32.mxu0 %vm808_vm4, %v798_v46 }
 0x2f1   : > { %v799_v49 = vadd.f32 %v797_v48, %v777_v32 }
 0x2f3   : > { %1295 = vmatmul.mubr.msk.f32.vlgmr.msra.gmra.mxu0 %vm808_vm4, %v799_v49 }
 0x2f4   : > { %1298 = vmatpush3.msra.mxu0 %v899_v50 }
 0x2f5   : > { %1299 = vmatprep.subr.mxu0 %v898_v51 }
 0x2f6   : > { %1300 = vmatpush3.msra.mxu0 %v898_v51 }
 0x2f7   : > { %1301 = vmatprep.subr.mxu0 %v897_v52 }
 0x2f8   : > { %1302 = vmatpush3.msra.mxu0 %v897_v52 }
 0x2f9   : > { %1303 = vmatprep.subr.mxu0 %v896_v53 }
 0x2fa   : > { %1304 = vmatpush3.msra.mxu0 %v896_v53 }
 0x3b3   : > { %v1296_v59 = vpop.f32.mrf.mxu0 }
 0x3b4   : > { %v891_v60 = vadd.f32 %v1296_v59, %v1202_v58 }
 0x3b5   : > { %v885_v61 = vpop.f32.mrf.mxu0 }
 0x3b6   : > { %v886_v62 = vadd.f32 %v1202_v58, %v885_v61  ;;  %v895_v0 = vmax.f32 %v891_v60, 0.0 }
 0x3b8   : > { %v894_v63 = vmax.f32 %v886_v62, 0.0 }
 0x3ba   : > { %1305 = vmatprep.mubr.msk.f32.mxu0 %vm698_vm2, %v894_v63 }
 0x3bb   : > { %1306 = vmatmul.mubr.msk.f32.vlgmr.msra.gmra.mxu0 %vm698_vm2, %v895_v0 }
 0x47b   : > { %v1307_v6 = vpop.f32.mrf.mxu0 }
 0x47c   : > { %v985_v7 = vadd.f32 %v1307_v6, %v1206_v5 }
 0x47d   : > { %v979_v8 = vpop.f32.mrf.mxu0 }
 0x47e   : > { %v980_v9 = vadd.f32 %v1206_v5, %v979_v8  ;;  %v989_v11 = vmax.f32 %v985_v7, 0.0 }
 0x480   : > { %v988_v10 = vmax.f32 %v980_v9, 0.0 }
 0x482   : > { %1324 = vmatprep.mubr.msk.f32.mxu1 %vm603_vm1, %v988_v10 }
 0x483   : > { %1325 = vmatmul.mubr.msk.f32.vlgmr.msra.gmra.mxu1 %vm603_vm1, %v989_v11 }
 0x543   : > { %v1326_v13 = vpop.f32.mrf.mxu1 }
 0x544   : > { %v1083_v14 = vadd.f32 %v1326_v13, %v1209_v12 }
 0x545   : > { %v1077_v15 = vpop.f32.mrf.mxu1 }
 0x546   : > { %v1213_v16 = vmul.f32 -1.442695, %v1083_v14  ;;  %v1078_v17 = vadd.f32 %v1209_v12, %v1077_v15 }
 0x548   : > { %1341 = vpow2.f32 %v1213_v16  ;;  %v1212_v18 = vmul.f32 -1.442695, %v1078_v17 }
 0x54a   : > { %1343 = vpow2.f32 %v1212_v18 }
 0x555   : > { %v1342_v19 = vpop.eup %1341 }
 0x556   : > { %v1093_v20 = vadd.f32 1.0, %v1342_v19 }
 0x557   : > { %v1344_v21 = vpop.eup %1343 }
 0x558   : > { %1345 = vrcp.f32 %v1093_v20  ;;  %v1092_v22 = vadd.f32 1.0, %v1344_v21 }
 0x55a   : > { %1347 = vrcp.f32 %v1092_v22 }
 0x565   : > { %v1346_v24 = vpop.eup %1345 }
 0x566   : > { %v1107_v27 = vsel %vm504_vm0, %v1346_v24, %v1103_v25 }
 0x567   : > { %v1348_v26 = vpop.eup %1347  ;;  %v1110_v30 = vsel %vm1108_vm5, %v1107_v27, %v1103_v25 }
 0x568   : > { %v1106_v28 = vsel %vm504_vm0, %v1348_v26, %v1101_v23  ;;  %1113 = vst.msk [vmem:[%s491_s22 + $0x8] sm:$0xff] %vm1111_vm6, %v1110_v30 }
 0x569   : > { %v1109_v29 = vsel %vm1108_vm5, %v1106_v28, %v1101_v23 }
 0x56a   : > { %1112 = vst.msk [vmem:[%s491_s22] sm:$0xff] %vm1111_vm6, %v1109_v29 }
 0x56b PF: > { %s24_s29 = sadd.s32 1, %s1355_s29  }
 0x56c   : > { %p21_p4 = scmp.ge.s32.totalorder %s24_s29, 6  }
 0x56e   :  { %23 = sbr.rel (!%p21_p4) target bundleno = 1 (0x1), region = 109 }

</bundles_post_ra>
